<compile_context>
chip_gen: v5e
topology: v5e:2x2
jax: 0.10.0
libtpu: 0.0.40
codegen_flags: <defaults>
</compile_context>

<pallas_src>
import functools

import jax
import jax.numpy as jnp
from jax.experimental import pallas as pl
from jax.experimental.pallas import tpu as pltpu


def _mlp_kernel(x_ref, w1_ref, b1_ref, w2_ref, b2_ref, w3_ref, b3_ref, o_ref,
                *, lane_chunk, n_chunks):
    # Weights / biases are tiny and loop-invariant: load once per grid step.
    w1, b1 = w1_ref[...], b1_ref[...]    # (h1, in_dim), (h1, 1)
    w2, b2 = w2_ref[...], b2_ref[...]    # (h2, h1),     (h2, 1)
    w3, b3 = w3_ref[...], b3_ref[...]    # (1,  h2),     (1, 1)

    # Strip-mine the (out_dim, tm) tile into register-resident lane chunks so
    # h1/h2 never spill through the vld/vst slots.  n_chunks is a small static
    # Python int (<= 4), so this unrolls into straight-line code.
    for c in range(n_chunks):
        cols = pl.ds(c * lane_chunk, lane_chunk)          # static, aligned start
        x_c = x_ref[:, cols]                              # (in_dim, lc), batch on lanes

        # Layer 1 on the MXU (K = in_dim = 3); only bias-add + ReLU on the VPU.
        # NOTE: folding b1 into the matmul via a ones-row augmentation was
        # considered, but the sublane-axis concat of a (3, lc) block risks a
        # relayout; with the FMA chain gone the single vadd rides VALU slack.
        h1 = jnp.dot(w1, x_c, preferred_element_type=jnp.float32)
        h1 = jnp.maximum(h1 + b1, 0.0)                    # (h1, lc)
        # Dropout(0.2): identity in eval/inference mode.

        # Layer 2 on the MXU, f32 accumulation.
        h2 = jnp.dot(w2, h1, preferred_element_type=jnp.float32)
        h2 = jnp.maximum(h2 + b2, 0.0)                    # (h2, lc)
        # Dropout(0.2): identity in eval/inference mode.

        # Layer 3 stays on the MXU (M=1 pops are cheap; avoids an XLU reduce).
        out = jnp.dot(w3, h2, preferred_element_type=jnp.float32) + b3
        o_ref[:, cols] = out.astype(o_ref.dtype)          # lane-dense (1, lc) slab


def _pick_lane_chunk(tm):
    for c in (512, 256, 128):
        if tm % c == 0:
            return c
    return tm


def fault_prediction_forward_fm(x_fm, params, *, tm=None):
    """Feature-major forward. x_fm: (in_dim, B) float32 -> (out_dim, B) float32.

    Preferred entry point: no transpose, no padding, batch rides the lane axis.
    """
    in_dim, B = x_fm.shape
    w1, b1, w2, b2, w3, b3 = (params[k] for k in ("w1", "b1", "w2", "b2", "w3", "b3"))
    h1_dim, h2_dim, out_dim = w1.shape[0], w2.shape[0], w3.shape[0]

    if tm is None:
        # Aim for >=4 grid steps on large batches (>=2 per v7x TensorCore so the
        # BlockSpec pipeline actually prefetches); cap the tile at 2048 lanes.
        # tm is kept a multiple of the 512-lane strip so the chunk loop divides
        # evenly.  VMEM stays ~0.2 MiB — irrelevant on v5e/v6e/v7x.
        tm = min(2048, max(512, pl.cdiv(pl.cdiv(B, 4), 512) * 512))
    lane_chunk = _pick_lane_chunk(tm)
    n_chunks = tm // lane_chunk
    n_tiles = pl.cdiv(B, tm)   # partial last block handled by Pallas (no host pad)

    kernel = functools.partial(_mlp_kernel, lane_chunk=lane_chunk, n_chunks=n_chunks)
    rep = lambda shape: pl.BlockSpec(shape, lambda i: (0, 0))   # replicated weights

    return pl.pallas_call(
        kernel,
        out_shape=jax.ShapeDtypeStruct((out_dim, B), jnp.float32),
        grid_spec=pltpu.PrefetchScalarGridSpec(
            num_scalar_prefetch=0,
            grid=(n_tiles,),
            in_specs=[
                pl.BlockSpec((in_dim, tm), lambda i: (0, i)),   # x tile, batch on lanes
                rep((h1_dim, in_dim)),                          # w1
                rep((h1_dim, 1)),                               # b1
                rep((h2_dim, h1_dim)),                          # w2
                rep((h2_dim, 1)),                               # b2
                rep((out_dim, h2_dim)),                         # w3
                rep((out_dim, 1)),                              # b3
            ],
            out_specs=pl.BlockSpec((out_dim, tm), lambda i: (0, i)),  # lane-dense output
        ),
        compiler_params=pltpu.CompilerParams(
            dimension_semantics=("parallel",),
            vmem_limit_bytes=32 * 1024 * 1024,
        ),
    )(x_fm, w1, b1, w2, b2, w3, b3)


def fault_prediction_forward(x, params, *, tm=None):
    """PyTorch-layout forward. x: (B, in_dim) float32 -> (B, 1) float32.

    Only does a single small transpose (no zero-pad materialization); callers
    that can supply feature-major data should use fault_prediction_forward_fm.
    """
    out_fm = fault_prediction_forward_fm(x.T, params, tm=tm)   # (1, B)
    return out_fm.T                                            # (B, 1)


def init_params(key, input_size=3, hidden_size=64):
    """Deterministic synthetic init mirroring nn.Linear shapes: weight (out, in), bias (out, 1)."""
    k1, k2, k3, k4, k5, k6 = jax.random.split(key, 6)
    h2 = hidden_size // 2
    s1 = 1.0 / jnp.sqrt(input_size)
    s2 = 1.0 / jnp.sqrt(hidden_size)
    s3 = 1.0 / jnp.sqrt(h2)
    return {
        "w1": jax.random.uniform(k1, (hidden_size, input_size), jnp.float32, -s1, s1),
        "b1": jax.random.uniform(k2, (hidden_size, 1), jnp.float32, -s1, s1),
        "w2": jax.random.uniform(k3, (h2, hidden_size), jnp.float32, -s2, s2),
        "b2": jax.random.uniform(k4, (h2, 1), jnp.float32, -s2, s2),
        "w3": jax.random.uniform(k5, (1, h2), jnp.float32, -s3, s3),
        "b3": jax.random.uniform(k6, (1, 1), jnp.float32, -s3, s3),
    }


def reference_forward(x, params):
    hp = jax.lax.Precision.HIGHEST
    h1 = jnp.maximum(jnp.dot(x, params["w1"].T, precision=hp) + params["b1"].T, 0.0)
    h2 = jnp.maximum(jnp.dot(h1, params["w2"].T, precision=hp) + params["b2"].T, 0.0)
    return jnp.dot(h2, params["w3"].T, precision=hp) + params["b3"].T


if __name__ == "__main__":
    key = jax.random.PRNGKey(0)
    kp, kx = jax.random.split(key)
    params = init_params(kp, input_size=3, hidden_size=64)

    # Telemetry rows: (temperature, pressure, vibration).  batch=1000 gives
    # tm=512 -> a 2-step grid with a partial (488-row) last block, exercising
    # both the multi-tile path and Pallas's masked edge handling.
    batch = 1000
    x = jax.random.normal(kx, (batch, 3), jnp.float32)

    out = jax.block_until_ready(fault_prediction_forward(x, params))
    ref = reference_forward(x, params)

    assert out.shape == (batch, 1)
    assert jnp.allclose(out, ref, atol=1e-5, rtol=1e-5), "mismatch vs JAX reference"

    print("KERNEL_OK")
</pallas_src>

<mosaic_0001>
module attributes {stable_mosaic.version = 11 : i64} {
  func.func @_mlp_kernel(%arg0: i32, %arg1: memref<3x512xf32, #tpu.memory_space<vmem>>, %arg2: memref<64x3xf32, #tpu.memory_space<vmem>>, %arg3: memref<64x1xf32, #tpu.memory_space<vmem>>, %arg4: memref<32x64xf32, #tpu.memory_space<vmem>>, %arg5: memref<32x1xf32, #tpu.memory_space<vmem>>, %arg6: memref<1x32xf32, #tpu.memory_space<vmem>>, %arg7: memref<1x1xf32, #tpu.memory_space<vmem>>, %arg8: memref<1x512xf32, #tpu.memory_space<vmem>>) attributes {dimension_semantics = [#tpu.dimension_semantics<parallel>], iteration_bounds = array<i64: 2>, scalar_prefetch = 0 : i64, scratch_operands = 0 : i64, tpu.core_type = #tpu.core_type<tc>, window_params = [{transform_indices = @transform_0, window_bounds = array<i64: 3, 512>}, {pipeline_mode = #tpu.pipeline_mode<synchronous>, transform_indices = @transform_1, window_bounds = array<i64: 64, 3>}, {pipeline_mode = #tpu.pipeline_mode<synchronous>, transform_indices = @transform_2, window_bounds = array<i64: 64, 1>}, {pipeline_mode = #tpu.pipeline_mode<synchronous>, transform_indices = @transform_3, window_bounds = array<i64: 32, 64>}, {pipeline_mode = #tpu.pipeline_mode<synchronous>, transform_indices = @transform_4, window_bounds = array<i64: 32, 1>}, {pipeline_mode = #tpu.pipeline_mode<synchronous>, transform_indices = @transform_5, window_bounds = array<i64: 1, 32>}, {pipeline_mode = #tpu.pipeline_mode<synchronous>, transform_indices = @transform_6, window_bounds = array<i64: 1, 1>}, {transform_indices = @transform_7, window_bounds = array<i64: 1, 512>}]} {
    %c0 = arith.constant 0 : index
    %c0_0 = arith.constant 0 : index
    %0 = vector.load %arg2[%c0, %c0_0] : memref<64x3xf32, #tpu.memory_space<vmem>>, vector<64x3xf32>
    %c0_1 = arith.constant 0 : index
    %c0_2 = arith.constant 0 : index
    %1 = vector.load %arg3[%c0_1, %c0_2] : memref<64x1xf32, #tpu.memory_space<vmem>>, vector<64x1xf32>
    %c0_3 = arith.constant 0 : index
    %c0_4 = arith.constant 0 : index
    %2 = vector.load %arg4[%c0_3, %c0_4] : memref<32x64xf32, #tpu.memory_space<vmem>>, vector<32x64xf32>
    %c0_5 = arith.constant 0 : index
    %c0_6 = arith.constant 0 : index
    %3 = vector.load %arg5[%c0_5, %c0_6] : memref<32x1xf32, #tpu.memory_space<vmem>>, vector<32x1xf32>
    %c0_7 = arith.constant 0 : index
    %c0_8 = arith.constant 0 : index
    %4 = vector.load %arg6[%c0_7, %c0_8] : memref<1x32xf32, #tpu.memory_space<vmem>>, vector<1x32xf32>
    %c0_9 = arith.constant 0 : index
    %c0_10 = arith.constant 0 : index
    %5 = vector.load %arg7[%c0_9, %c0_10] : memref<1x1xf32, #tpu.memory_space<vmem>>, vector<1x1xf32>
    %c0_11 = arith.constant 0 : index
    %c0_12 = arith.constant 0 : index
    %6 = vector.load %arg1[%c0_11, %c0_12] : memref<3x512xf32, #tpu.memory_space<vmem>>, vector<3x512xf32>
    %cst = arith.constant dense<0.000000e+00> : vector<64x512xf32>
    %7 = tpu.matmul %0, %6, %cst {dimension_numbers = #tpu.dot_dimension_numbers<[1], [0], [0], [1], [0, 0, 1, 1], [], []>} : vector<64x3xf32>, vector<3x512xf32>, vector<64x512xf32> -> vector<64x512xf32>
    %8 = vector.broadcast %1 : vector<64x1xf32> to vector<64x512xf32>
    %9 = arith.addf %7, %8 : vector<64x512xf32>
    %cst_13 = arith.constant 0.000000e+00 : f32
    %10 = vector.broadcast %cst_13 : f32 to vector<64x512xf32>
    %11 = arith.maximumf %9, %10 : vector<64x512xf32>
    %cst_14 = arith.constant dense<0.000000e+00> : vector<32x512xf32>
    %12 = tpu.matmul %2, %11, %cst_14 {dimension_numbers = #tpu.dot_dimension_numbers<[1], [0], [0], [1], [0, 0, 1, 1], [], []>} : vector<32x64xf32>, vector<64x512xf32>, vector<32x512xf32> -> vector<32x512xf32>
    %13 = vector.broadcast %3 : vector<32x1xf32> to vector<32x512xf32>
    %14 = arith.addf %12, %13 : vector<32x512xf32>
    %cst_15 = arith.constant 0.000000e+00 : f32
    %15 = vector.broadcast %cst_15 : f32 to vector<32x512xf32>
    %16 = arith.maximumf %14, %15 : vector<32x512xf32>
    %cst_16 = arith.constant dense<0.000000e+00> : vector<1x512xf32>
    %17 = tpu.matmul %4, %16, %cst_16 {dimension_numbers = #tpu.dot_dimension_numbers<[1], [0], [0], [1], [0, 0, 1, 1], [], []>} : vector<1x32xf32>, vector<32x512xf32>, vector<1x512xf32> -> vector<1x512xf32>
    %18 = vector.broadcast %5 : vector<1x1xf32> to vector<1x512xf32>
    %19 = arith.addf %17, %18 : vector<1x512xf32>
    %c0_17 = arith.constant 0 : index
    %c0_18 = arith.constant 0 : index
    %20 = vector.load %arg8[%c0_17, %c0_18] : memref<1x512xf32, #tpu.memory_space<vmem>>, vector<1x512xf32>
    tpu.vector_store %arg8[%c0_17, %c0_18], %19 {strides = array<i32>} : memref<1x512xf32, #tpu.memory_space<vmem>>, vector<1x512xf32>,
    return
  }
  func.func @transform_0(%arg0: i32) -> (i32, i32) {
    %c0_i32 = arith.constant 0 : i32
    %c0_i32_0 = arith.constant 0 : i32
    return %c0_i32, %arg0 : i32, i32
  }
  func.func @transform_1(%arg0: i32) -> (i32, i32) {
    %c0_i32 = arith.constant 0 : i32
    %c0_i32_0 = arith.constant 0 : i32
    %c0_i32_1 = arith.constant 0 : i32
    return %c0_i32, %c0_i32_0 : i32, i32
  }
  func.func @transform_2(%arg0: i32) -> (i32, i32) {
    %c0_i32 = arith.constant 0 : i32
    %c0_i32_0 = arith.constant 0 : i32
    %c0_i32_1 = arith.constant 0 : i32
    return %c0_i32, %c0_i32_0 : i32, i32
  }
  func.func @transform_3(%arg0: i32) -> (i32, i32) {
    %c0_i32 = arith.constant 0 : i32
    %c0_i32_0 = arith.constant 0 : i32
    %c0_i32_1 = arith.constant 0 : i32
    return %c0_i32, %c0_i32_0 : i32, i32
  }
  func.func @transform_4(%arg0: i32) -> (i32, i32) {
    %c0_i32 = arith.constant 0 : i32
    %c0_i32_0 = arith.constant 0 : i32
    %c0_i32_1 = arith.constant 0 : i32
    return %c0_i32, %c0_i32_0 : i32, i32
  }
  func.func @transform_5(%arg0: i32) -> (i32, i32) {
    %c0_i32 = arith.constant 0 : i32
    %c0_i32_0 = arith.constant 0 : i32
    %c0_i32_1 = arith.constant 0 : i32
    return %c0_i32, %c0_i32_0 : i32, i32
  }
  func.func @transform_6(%arg0: i32) -> (i32, i32) {
    %c0_i32 = arith.constant 0 : i32
    %c0_i32_0 = arith.constant 0 : i32
    %c0_i32_1 = arith.constant 0 : i32
    return %c0_i32, %c0_i32_0 : i32, i32
  }
  func.func @transform_7(%arg0: i32) -> (i32, i32) {
    %c0_i32 = arith.constant 0 : i32
    %c0_i32_0 = arith.constant 0 : i32
    return %c0_i32, %arg0 : i32, i32
  }
}

</mosaic_0001>

<bundles_post_ra>
// kernel: tpu_custom_call.1
= control target key start
LH: loop header
LB: loop body
LE: loop exit
PB: predicated region body
PF: predicated region fallthrough
CT: control target
= control target key end

     0   :  { %s1409_s0 = inlined_call_operand.vmem [shape: f32[3,1000], index: 0, kind: input, shape index: {}]   ;;  %s1410_s1 = inlined_call_operand.vmem [shape: f32[64,3], index: 1, kind: input, shape index: {}]   ;;  %s1411_s2 = inlined_call_operand.vmem [shape: f32[64,1], index: 2, kind: input, shape index: {}]   ;;  %s1412_s3 = inlined_call_operand.vmem [shape: f32[32,64], index: 3, kind: input, shape index: {}]   ;;  %s1413_s4 = inlined_call_operand.vmem [shape: f32[32,1], index: 4, kind: input, shape index: {}]   ;;  %s1414_s5 = inlined_call_operand.vmem [shape: f32[1,32], index: 5, kind: input, shape index: {}]   ;;  %s1415_s6 = inlined_call_operand.<no memory space> [shape: f32[1,1], index: 6, kind: input, shape index: {}]   ;;  %s1416_s7 = inlined_call_operand.hbm [shape: f32[1,1000], index: 7, kind: output, shape index: {}]  }
   0x1   :  { %v12_v0 = vstv %s1415_s6 }
   0x2   :  { %13 = vst [vmem:[#allocation2] sm:$0x1] %v12_v0 }
   0x3   :  { %14 = vsyncpa [#allocation4], 0 }
   0x4   :  { %16 = vsyncpa [#allocation4 + $0x1], 0  ;;  %s1156_s26 = smov 0   ;;  %s1158_s27 = smov 0  }
   0x5   :  { %s1160_s28 = smov 0   ;;  %s1162_s29 = smov 0  }
   0x6 LB: > { %s937_s6 = sadd.s32 4294967295, %s1110_s29   ;;  %s938_s30 = sadd.s32 4294967294, %s1110_s29   ;;  %s1110_s29 = sphi %s1162_s29, %s1422_s29   ;;  %s1106_s28 = sphi %s1160_s28, %s1421_s28   ;;  %s1102_s27 = sphi %s1158_s27, %s1420_s27   ;;  %s1098_s26 = sphi %s1156_s26, %s1419_s26  }
   0x7   : > { %s1179_s8 = sadd.s32 1, %s1110_s29   ;;  %s181_s9 = sadd.s32 1, %s1106_s28 }
   0x8   : > { %s178_s10 = ssub.s32 %s1110_s29, %s1179_s8  ;;  %p191_p0 = scmp.ne.s32.totalorder %s1106_s28, %s1102_s27 }
   0x9   : > { %p179_p1 = scmp.eq.s32.totalorder %s178_s10, 0  ;;  %p192_p2 = scmp.eq.s32.totalorder %s937_s6, 1 }
   0xa   : > { %p197_p3 = scmp.ne.s32.totalorder %s1102_s27, %s1098_s26  ;;  %p198_p4 = scmp.eq.s32.totalorder %s938_s30, 1 }
   0xb   : > { %s1189_s11 = scalar_select %p179_p1, %s1106_s28, %s181_s9  }
   0xc   : > { %p1191_p5 = por %p192_p2, %p191_p0  ;;  %p1195_p6 = por %p198_p4, %p197_p3 }
   0xd   : > { %p941_p7 = scmp.ge.s32.totalorder %s1110_s29, 1  ;;  %p243_p8 = scmp.lt.s32.totalorder %s1110_s29, 3 }
   0xf   : > { %p244_p9 = pnand %p941_p7, %p243_p8 }
  0x10   : > { %s1201_s14 = sshll.u32 (!%p244_p9), %s937_s6, 2  ;;  %s272_s25 = sand.u32 (!%p244_p9), 1, %s1102_s27  }
  0x11   : > { %247 = sbr.rel (%p244_p9) target bundleno = 553 (0x229), region = 48  ;;  %p276_p10 = scmp.lt.s32.totalorder (!%p244_p9), %s1201_s14, 7 }
  0x12   : > { %s942_s6 = sshll.u32 (!%p244_p9), %s272_s25, 2  ;;  %s874_s10 = scalar_lea.hbm (!%p244_p9), %s1416_s7, %s1201_s14 }
  0x13   : > { %s274_s15 = scalar_lea.vmem (!%p244_p9), [#allocation3], %s942_s6  ;;  %s878_s17 = sshll.u32 (!%p244_p9), %s874_s10, 4  ;;  %s879_s17 = int_to_ptr.hbm [resolvable:$true] %s878_s17 }
  0x14   : > { %s876_s16 = sshll.u32 (!%p244_p9), %s274_s15, 4  ;;  %s1062_s18 = sshra.s32 (!%p244_p9), %s879_s17, 4  ;;  %s877_s16 = int_to_ptr.vmem [resolvable:$true] %s876_s16  ;;  %s1063_s18 = int_to_ptr.hbm [resolvable:$true] %s1062_s18 }
  0x15   : > { %s1068_s22 = scalar_lea.hbm (!%p244_p9), %s1416_s7, 8  ;;  %p1069_p0 = scmp.lt.s32.totalorder (!%p244_p9), %s1063_s18, %s1416_s7 }
  0x16   : > { %v295_v1 = vld [vmem:[%s1411_s2 + $0x28] sm:$0xff]  ;;  %v1112_v2 = vmov 0   ;;  %v297_v3 = vld [vmem:[%s1411_s2 + $0x38] sm:$0xff]  ;;  %s277_s19 = scalar_select %p276_p10, %s1201_s14, 7  ;;  %v294_v4 = vld [vmem:[%s1411_s2 + $0x20] sm:$0xff]  ;;  %vm384_vm0 = vcmask 1042432  }
  0x17   : > { %1046 = vset.pattern.permute.xlu1 %v1112_v2  ;;  %1045 = vset.pattern.permute.xlu0 %v1112_v2  ;;  %v296_v7 = vld [vmem:[%s1411_s2 + $0x30] sm:$0xff]  ;;  %v282_v8 = vld [vmem:[%s1410_s1] sm:$0xff]  ;;  %vm359_vm1 = vcmask 23552   ;;  %v291_v14 = vld [vmem:[%s1411_s2 + $0x8] sm:$0xff]  ;;  %vm609_vm2 = vcmask 523264   ;;  %vm760_vm3 = vcmask 261120  }
  0x18   : > { %337 = vperm.xlu1 %1046, %v295_v1   ;;  %347 = vperm.xlu0 %1045, %v297_v3   ;;  %s944_s20 = sshll.u32 %s277_s19, 2  ;;  %v290_v13 = vld [vmem:[%s1411_s2] sm:$0xff]  ;;  %v283_v15 = vld [vmem:[%s1410_s1 + $0x8] sm:$0xff]  ;;  %v284_v16 = vld [vmem:[%s1410_s1 + $0x10] sm:$0xff]  ;;  %vm851_vm4 = vcmask 1040384   ;;  %vm853_vm5 = vcmask 1042434  }
  0x19   : > { %1047 = vset.pattern.permute.xlu2 %v1112_v2  ;;  %s279_s23 = scalar_lea.vmem %s1409_s0, %s944_s20  ;;  %v293_v17 = vld [vmem:[%s1411_s2 + $0x18] sm:$0xff]  ;;  %v292_v19 = vld [vmem:[%s1411_s2 + $0x10] sm:$0xff]  ;;  %v303_v21 = vld [vmem:[%s1413_s4 + $0x8] sm:$0xff]  ;;  %vm855_vm6 = vcmask 1041408   ;;  %s864_s14 = scalar_lea.sflag [#allocation4], %s272_s25 }
  0x1a   : > { %v308_v5 = vld [vmem:[%s279_s23] sm:$0x77]  ;;  %v309_v6 = vld [vmem:[%s279_s23 + $0x8] sm:$0x77]  ;;  %327 = vperm.xlu2 %1047, %v293_v17   ;;  %v285_v18 = vld [vmem:[%s1410_s1 + $0x18] sm:$0xff]  ;;  %s1064_s19 = scalar_lea.hbm %s1063_s18, 4 }
  0x1b   : > { %352 = vst [vmem:[#allocation1] ss:$2 sm:$0xff] %v308_v5  ;;  %v304_v20 = vld [vmem:[%s1413_s4 + $0x10] sm:$0xff]  ;;  %v286_v22 = vld [vmem:[%s1410_s1 + $0x20] sm:$0xff]  ;;  %v307_v23 = vld [vmem:[#allocation2] sm:$0x1]  ;;  %p1065_p11 = scmp.ne.s32.totalorder %s1063_s18, %s1064_s19  ;;  %p1070_p1 = scmp.lt.s32.totalorder %s1068_s22, %s1064_s19 }
  0x1c   : > { %354 = vst [vmem:[#allocation1 + $0x10] ss:$2 sm:$0xff] %v309_v6  ;;  %v287_v24 = vld [vmem:[%s1410_s1 + $0x28] sm:$0xff]  ;;  %v288_v25 = vld [vmem:[%s1410_s1 + $0x30] sm:$0xff]  ;;  %v289_v26 = vld [vmem:[%s1410_s1 + $0x38] sm:$0xff] }
  0x1d   : > { %v305_v27 = vld [vmem:[%s1413_s4 + $0x18] sm:$0xff]  ;;  %v302_v28 = vld [vmem:[%s1413_s4] sm:$0xff]  ;;  %p1066_p12 = pnand %p1065_p11, %p1191_p5  ;;  %p1071_p2 = por %p1070_p1, %p1069_p0 }
  0x1f   : > { %p1067_p13 = pneg %p1066_p12 }
  0x20   : > { %332 = vperm.xlu1 %1046, %v294_v4   ;;  %342 = vperm.xlu0 %1045, %v296_v7  }
  0x21   : > { %p1072_p3 = pnand %p1071_p2, %p1067_p13 }
  0x22   : > { %v355_v9 = vld.sshfl [vmem:[#allocation1] sm:$0xff pattern:$0x75316420]  ;;  %v356_v10 = vld.sshfl [vmem:[#allocation1 + $0x8] sm:$0xff pattern:$0x75316420]  ;;  %322 = vperm.xlu2 %1047, %v292_v19  }
  0x23   : > { %945 = vmatpush.msk.msra.mxu0 %vm384_vm0, %v355_v9  ;;  %954 = vmatpush.msk.msra.mxu1 %vm384_vm0, %v356_v10  ;;  %v357_v11 = vld.sshfl [vmem:[#allocation1 + $0x10] sm:$0xff pattern:$0x75316420]  ;;  %v358_v12 = vld.sshfl [vmem:[#allocation1 + $0x18] sm:$0xff pattern:$0x75316420] }
  0x24   : > { %963 = vmatpush.msk.msra.mxu2 %vm384_vm0, %v357_v11  ;;  %972 = vmatpush.msk.msra.mxu3 %vm384_vm0, %v358_v12 }
  0x25   : > { %946 = vmatmul.msk.f32.vlgmr.msra.gmra.mxu0 %vm359_vm1, %v282_v8  ;;  %955 = vmatmul.msk.f32.vlgmr.msra.gmra.mxu1 %vm359_vm1, %v282_v8 }
  0x26   : > { %964 = vmatmul.msk.f32.vlgmr.msra.gmra.mxu2 %vm359_vm1, %v282_v8  ;;  %973 = vmatmul.msk.f32.vlgmr.msra.gmra.mxu3 %vm359_vm1, %v282_v8 }
  0x28   : > { %312 = vperm.xlu1 %1046, %v290_v13   ;;  %317 = vperm.xlu0 %1045, %v291_v14  }
  0x2a   : > { %606 = vperm.xlu2 %1047, %v305_v27  }
  0x2d   : > { %947 = vmatmul.msk.f32.gmra.mxu0 %vm359_vm1, %v283_v15  ;;  %956 = vmatmul.msk.f32.gmra.mxu1 %vm359_vm1, %v283_v15 }
  0x2e   : > { %965 = vmatmul.msk.f32.gmra.mxu2 %vm359_vm1, %v283_v15  ;;  %974 = vmatmul.msk.f32.gmra.mxu3 %vm359_vm1, %v283_v15 }
  0x30   : > { %601 = vperm.xlu0 %1045, %v304_v20   ;;  %596 = vperm.xlu1 %1046, %v303_v21  }
  0x32   : > { %591 = vperm.xlu2 %1047, %v302_v28  }
  0x35   : > { %948 = vmatmul.msk.f32.gmra.mxu0 %vm359_vm1, %v284_v16  ;;  %957 = vmatmul.msk.f32.gmra.mxu1 %vm359_vm1, %v284_v16 }
  0x36   : > { %966 = vmatmul.msk.f32.gmra.mxu2 %vm359_vm1, %v284_v16  ;;  %975 = vmatmul.msk.f32.gmra.mxu3 %vm359_vm1, %v284_v16 }
  0x38   : > { %756 = vperm.xlu0 %1045, %v307_v23  }
  0x3d   : > { %949 = vmatmul.msk.f32.gmra.mxu0 %vm359_vm1, %v285_v18  ;;  %958 = vmatmul.msk.f32.gmra.mxu1 %vm359_vm1, %v285_v18 }
  0x3e   : > { %967 = vmatmul.msk.f32.gmra.mxu2 %vm359_vm1, %v285_v18  ;;  %976 = vmatmul.msk.f32.gmra.mxu3 %vm359_vm1, %v285_v18 }
  0x45   : > { %950 = vmatmul.msk.f32.gmra.mxu0 %vm359_vm1, %v286_v22  ;;  %959 = vmatmul.msk.f32.gmra.mxu1 %vm359_vm1, %v286_v22 }
  0x46   : > { %968 = vmatmul.msk.f32.gmra.mxu2 %vm359_vm1, %v286_v22  ;;  %977 = vmatmul.msk.f32.gmra.mxu3 %vm359_vm1, %v286_v22 }
  0x4d   : > { %951 = vmatmul.msk.f32.gmra.mxu0 %vm359_vm1, %v287_v24  ;;  %960 = vmatmul.msk.f32.gmra.mxu1 %vm359_vm1, %v287_v24 }
  0x4e   : > { %969 = vmatmul.msk.f32.gmra.mxu2 %vm359_vm1, %v287_v24  ;;  %978 = vmatmul.msk.f32.gmra.mxu3 %vm359_vm1, %v287_v24 }
  0x55   : > { %952 = vmatmul.msk.f32.gmra.mxu0 %vm359_vm1, %v288_v25  ;;  %961 = vmatmul.msk.f32.gmra.mxu1 %vm359_vm1, %v288_v25 }
  0x56   : > { %970 = vmatmul.msk.f32.gmra.mxu2 %vm359_vm1, %v288_v25  ;;  %979 = vmatmul.msk.f32.gmra.mxu3 %vm359_vm1, %v288_v25 }
  0x5d   : > { %953 = vmatmul.msk.f32.gmra.mxu0 %vm359_vm1, %v289_v26  ;;  %962 = vmatmul.msk.f32.gmra.mxu1 %vm359_vm1, %v289_v26 }
  0x5e   : > { %971 = vmatmul.msk.f32.gmra.mxu2 %vm359_vm1, %v289_v26  ;;  %980 = vmatmul.msk.f32.gmra.mxu3 %vm359_vm1, %v289_v26 }
  0x74   : > { %v1324_v58 = vpop.permute.xlu2 %327 }
  0x7c   : > { %v323_v18 = vpop.permute.xlu2 %322 }
  0x8a   : > { %v348_v51 = vpop.permute.xlu0 %347  ;;  %v338_v52 = vpop.permute.xlu1 %337 }
  0x92   : > { %v343_v57 = vpop.permute.xlu0 %342  ;;  %v333_v4 = vpop.permute.xlu1 %332 }
  0x9a   : > { %v318_v27 = vpop.permute.xlu0 %317 }
  0xa2   : > { %v1300_v29 = vpop.f32.mrf.mxu0  ;;  %v1302_v30 = vpop.f32.mrf.mxu1 }
  0xa9   : > { %v1304_v31 = vpop.f32.mrf.mxu2  ;;  %v1306_v32 = vpop.f32.mrf.mxu3 }
  0xaa   : > { %v1308_v33 = vpop.f32.mrf.mxu0  ;;  %v1310_v34 = vpop.f32.mrf.mxu1 }
  0xb1   : > { %v1312_v35 = vpop.f32.mrf.mxu2  ;;  %v1314_v36 = vpop.f32.mrf.mxu3 }
  0xb2   : > { %v416_v37 = vpop.f32.mrf.mxu0  ;;  %v457_v38 = vpop.f32.mrf.mxu1 }
  0xb3   : > { %v417_v25 = vadd.f32 %v416_v37, %v323_v18  ;;  %v458_v26 = vadd.f32 %v457_v38, %v323_v18 }
  0xb5   : > { %v565_v37 = vmax.f32 %v417_v25, 0.0  ;;  %v566_v38 = vmax.f32 %v458_v26, 0.0 }
  0xb9   : > { %v1316_v39 = vpop.f32.mrf.mxu2  ;;  %v1318_v40 = vpop.f32.mrf.mxu3 }
  0xba   : > { %v419_v41 = vpop.f32.mrf.mxu0  ;;  %v460_v42 = vpop.f32.mrf.mxu1 }
  0xbb   : > { %v420_v13 = vadd.f32 %v419_v41, %v1324_v58  ;;  %v461_v14 = vadd.f32 %v460_v42, %v1324_v58 }
  0xc1   : > { %v1320_v43 = vpop.f32.mrf.mxu2  ;;  %v1322_v44 = vpop.f32.mrf.mxu3 }
  0xc2   : > { %v422_v45 = vpop.f32.mrf.mxu0  ;;  %v463_v46 = vpop.f32.mrf.mxu1 }
  0xc3   : > { %v423_v8 = vadd.f32 %v422_v45, %v333_v4  ;;  %v464_v9 = vadd.f32 %v463_v46, %v333_v4  ;;  %v569_v46 = vmax.f32 %v420_v13, 0.0 }
  0xc5   : > { %v573_v23 = vmax.f32 %v423_v8, 0.0  ;;  %v574_v24 = vmax.f32 %v464_v9, 0.0  ;;  %v301_v8 = vld [vmem:[%s1412_s3 + $0x18] sm:$0xff] }
  0xc9   : > { %v504_v47 = vpop.f32.mrf.mxu2  ;;  %v545_v48 = vpop.f32.mrf.mxu3 }
  0xca   : > { %v425_v49 = vpop.f32.mrf.mxu0  ;;  %v466_v50 = vpop.f32.mrf.mxu1 }
  0xcb   : > { %v426_v61 = vadd.f32 %v425_v49, %v338_v52  ;;  %v467_v5 = vadd.f32 %v466_v50, %v338_v52  ;;  %v570_v49 = vmax.f32 %v461_v14, 0.0  ;;  %v414_v50 = vadd.f32 %v1308_v33, %v318_v27 }
  0xcc   : > { %v502_v33 = vadd.f32 %v1320_v43, %v1324_v58  ;;  %v496_v43 = vadd.f32 %v1312_v35, %v318_v27 }
  0xcd   : > { %v577_v10 = vmax.f32 %v426_v61, 0.0  ;;  %v578_v15 = vmax.f32 %v467_v5, 0.0 }
  0xd1   : > { %v507_v53 = vpop.f32.mrf.mxu2  ;;  %v548_v54 = vpop.f32.mrf.mxu3 }
  0xd2   : > { %v428_v55 = vpop.f32.mrf.mxu0  ;;  %v469_v56 = vpop.f32.mrf.mxu1  ;;  %v508_v28 = vadd.f32 %v507_v53, %v338_v52  ;;  %v549_v41 = vadd.f32 %v548_v54, %v338_v52  ;;  %v561_v54 = vmax.f32 %v414_v50, 0.0 }
  0xd3   : > { %v429_v0 = vadd.f32 %v428_v55, %v343_v57  ;;  %v470_v1 = vadd.f32 %v469_v56, %v343_v57  ;;  %v455_v55 = vadd.f32 %v1310_v34, %v318_v27  ;;  %v505_v56 = vadd.f32 %v504_v47, %v333_v4 }
  0xd4   : > { %v543_v34 = vadd.f32 %v1322_v44, %v1324_v58  ;;  %v579_v47 = vmax.f32 %v508_v28, 0.0 }
  0xd5   : > { %v581_v11 = vmax.f32 %v429_v0, 0.0  ;;  %v582_v12 = vmax.f32 %v470_v1, 0.0  ;;  %v562_v61 = vmax.f32 %v455_v55, 0.0  ;;  %v537_v0 = vadd.f32 %v1314_v36, %v318_v27 }
  0xd6   : > { %v571_v1 = vmax.f32 %v502_v33, 0.0  ;;  %v563_v36 = vmax.f32 %v496_v43, 0.0 }
  0xd7   : > { %v564_v5 = vmax.f32 %v537_v0, 0.0 }
  0xd9   : > { %v510_v59 = vpop.f32.mrf.mxu2  ;;  %v551_v60 = vpop.f32.mrf.mxu3 }
  0xda   : > { %v431_v62 = vpop.f32.mrf.mxu0  ;;  %v472_v63 = vpop.f32.mrf.mxu1  ;;  %v511_v19 = vadd.f32 %v510_v59, %v343_v57  ;;  %v552_v20 = vadd.f32 %v551_v60, %v343_v57  ;;  %v546_v57 = vadd.f32 %v545_v48, %v333_v4  ;;  %v580_v48 = vmax.f32 %v549_v41, 0.0 }
  0xdb   : > { %v432_v2 = vadd.f32 %v431_v62, %v348_v51  ;;  %v473_v3 = vadd.f32 %v472_v63, %v348_v51  ;;  %v499_v62 = vadd.f32 %v1316_v39, %v323_v18  ;;  %v575_v63 = vmax.f32 %v505_v56, 0.0  ;;  %v298_v39 = vld [vmem:[%s1412_s3] sm:$0xff] }
  0xdc   : > { %v583_v59 = vmax.f32 %v511_v19, 0.0  ;;  %v584_v60 = vmax.f32 %v552_v20, 0.0  ;;  %v602_v20 = vpop.permute.xlu0 %601 }
  0xdd   : > { %v585_v6 = vmax.f32 %v432_v2, 0.0  ;;  %v586_v7 = vmax.f32 %v473_v3, 0.0  ;;  %v572_v2 = vmax.f32 %v543_v34, 0.0  ;;  %v567_v3 = vmax.f32 %v499_v62, 0.0 }
  0xdf   : > { %630 = vmatpush.msrb.mxu0 %v585_v6  ;;  %659 = vmatpush.msrb.mxu1 %v586_v7 }
  0xe1   : > { %v513_v16 = vpop.f32.mrf.mxu2  ;;  %v554_v17 = vpop.f32.mrf.mxu3  ;;  %631 = vmatpush.msrb.mxu0 %v581_v11  ;;  %660 = vmatpush.msrb.mxu1 %v582_v12 }
  0xe2   : > { %v514_v21 = vadd.f32 %v513_v16, %v348_v51  ;;  %v555_v22 = vadd.f32 %v554_v17, %v348_v51  ;;  %v313_v51 = vpop.permute.xlu1 %312  ;;  %v607_v17 = vpop.permute.xlu2 %606 }
  0xe3   : > { %632 = vmatpush.msrb.mxu0 %v577_v10  ;;  %661 = vmatpush.msrb.mxu1 %v578_v15  ;;  %v411_v52 = vadd.f32 %v1300_v29, %v313_v51  ;;  %v452_v53 = vadd.f32 %v1302_v30, %v313_v51  ;;  %v540_v29 = vadd.f32 %v1318_v40, %v323_v18  ;;  %v576_v30 = vmax.f32 %v546_v57, 0.0 }
  0xe4   : > { %v587_v42 = vmax.f32 %v514_v21, 0.0  ;;  %v588_v45 = vmax.f32 %v555_v22, 0.0  ;;  %v493_v40 = vadd.f32 %v1304_v31, %v313_v51  ;;  %v534_v35 = vadd.f32 %v1306_v32, %v313_v51  ;;  %v299_v31 = vld [vmem:[%s1412_s3 + $0x8] sm:$0xff]  ;;  %v300_v32 = vld [vmem:[%s1412_s3 + $0x10] sm:$0xff] }
  0xe5   : > { %633 = vmatpush.msrb.mxu0 %v573_v23  ;;  %662 = vmatpush.msrb.mxu1 %v574_v24  ;;  %v557_v44 = vmax.f32 %v411_v52, 0.0  ;;  %v558_v58 = vmax.f32 %v452_v53, 0.0  ;;  %v568_v4 = vmax.f32 %v540_v29, 0.0  ;;  %v306_v52 = vld [vmem:[%s1414_s5] sm:$0x1] }
  0xe6   : > { %688 = vmatpush.msrb.mxu2 %v587_v42  ;;  %717 = vmatpush.msrb.mxu3 %v588_v45  ;;  %v559_v6 = vmax.f32 %v493_v40, 0.0  ;;  %v560_v7 = vmax.f32 %v534_v35, 0.0  ;;  %v757_v40 = vpop.permute.xlu0 %756 }
  0xe7   : > { %634 = vmatpush.msrb.mxu0 %v569_v46  ;;  %663 = vmatpush.msrb.mxu1 %v570_v49 }
  0xe8   : > { %689 = vmatpush.msrb.mxu2 %v583_v59  ;;  %718 = vmatpush.msrb.mxu3 %v584_v60 }
  0xe9   : > { %635 = vmatpush.msrb.mxu0 %v565_v37  ;;  %664 = vmatpush.msrb.mxu1 %v566_v38 }
  0xea   : > { %690 = vmatpush.msrb.mxu2 %v579_v47  ;;  %719 = vmatpush.msrb.mxu3 %v580_v48  ;;  %v597_v27 = vpop.permute.xlu1 %596  ;;  %v592_v28 = vpop.permute.xlu2 %591 }
  0xeb   : > { %636 = vmatpush.msrb.mxu0 %v561_v54  ;;  %665 = vmatpush.msrb.mxu1 %v562_v61 }
  0xec   : > { %691 = vmatpush.msrb.mxu2 %v575_v63  ;;  %720 = vmatpush.msrb.mxu3 %v576_v30 }
  0xed   : > { %637 = vmatpush.msrb.mxu0 %v557_v44  ;;  %666 = vmatpush.msrb.mxu1 %v558_v58 }
  0xee   : > { %692 = vmatpush.msrb.mxu2 %v571_v1  ;;  %721 = vmatpush.msrb.mxu3 %v572_v2 }
  0xef   : > { %981 = vmatmul.msk.f32.vlgmr.msrb.gmra.mxu0 %vm609_vm2, %v298_v39  ;;  %985 = vmatmul.msk.f32.vlgmr.msrb.gmra.mxu1 %vm609_vm2, %v298_v39 }
  0xf0   : > { %693 = vmatpush.msrb.mxu2 %v567_v3  ;;  %722 = vmatpush.msrb.mxu3 %v568_v4  ;;  %v759_v3 = vperm.slane %v757_v40, 0 }
  0xf2   : > { %694 = vmatpush.msrb.mxu2 %v563_v36  ;;  %723 = vmatpush.msrb.mxu3 %v564_v5 }
  0xf4   : > { %695 = vmatpush.msrb.mxu2 %v559_v6  ;;  %724 = vmatpush.msrb.mxu3 %v560_v7  ;;  %v858_v7 = vlaneseq }
  0xf5   : > { %989 = vmatmul.msk.f32.vlgmr.msrb.gmra.mxu2 %vm609_vm2, %v298_v39  ;;  %993 = vmatmul.msk.f32.vlgmr.msrb.gmra.mxu3 %vm609_vm2, %v298_v39 }
  0xf6   : > { %vm860_vm7 = vcmp.lt.s32.totalorder %v858_v7, 512 }
  0xf7   : > { %982 = vmatmul.msk.f32.gmra.mxu0 %vm609_vm2, %v299_v31  ;;  %986 = vmatmul.msk.f32.gmra.mxu1 %vm609_vm2, %v299_v31 }
  0xfd   : > { %990 = vmatmul.msk.f32.gmra.mxu2 %vm609_vm2, %v299_v31  ;;  %994 = vmatmul.msk.f32.gmra.mxu3 %vm609_vm2, %v299_v31 }
  0xff   : > { %983 = vmatmul.msk.f32.gmra.mxu0 %vm609_vm2, %v300_v32  ;;  %987 = vmatmul.msk.f32.gmra.mxu1 %vm609_vm2, %v300_v32 }
 0x105   : > { %991 = vmatmul.msk.f32.gmra.mxu2 %vm609_vm2, %v300_v32  ;;  %995 = vmatmul.msk.f32.gmra.mxu3 %vm609_vm2, %v300_v32 }
 0x107   : > { %984 = vmatmul.msk.f32.gmra.mxu0 %vm609_vm2, %v301_v8  ;;  %988 = vmatmul.msk.f32.gmra.mxu1 %vm609_vm2, %v301_v8 }
 0x10d   : > { %992 = vmatmul.msk.f32.gmra.mxu2 %vm609_vm2, %v301_v8  ;;  %996 = vmatmul.msk.f32.gmra.mxu3 %vm609_vm2, %v301_v8 }
 0x16c   : > { %v639_v9 = vpop.f32.mrf.mxu0  ;;  %v668_v10 = vpop.f32.mrf.mxu1 }
 0x16d   : > { %v640_v55 = vadd.f32 %v639_v9, %v592_v28  ;;  %v669_v51 = vadd.f32 %v668_v10, %v592_v28 }
 0x16f   : > { %v738_v37 = vmax.f32 %v640_v55, 0.0  ;;  %v739_v38 = vmax.f32 %v669_v51, 0.0 }
 0x174   : > { %v642_v11 = vpop.f32.mrf.mxu0  ;;  %v671_v12 = vpop.f32.mrf.mxu1 }
 0x175   : > { %v643_v41 = vadd.f32 %v642_v11, %v597_v27  ;;  %v672_v42 = vadd.f32 %v671_v12, %v597_v27 }
 0x177   : > { %v742_v59 = vmax.f32 %v643_v41, 0.0  ;;  %v743_v60 = vmax.f32 %v672_v42, 0.0 }
 0x178   : > { %v697_v13 = vpop.f32.mrf.mxu2  ;;  %v726_v14 = vpop.f32.mrf.mxu3 }
 0x179   : > { %v698_v30 = vadd.f32 %v697_v13, %v592_v28  ;;  %v727_v43 = vadd.f32 %v726_v14, %v592_v28 }
 0x17b   : > { %v740_v2 = vmax.f32 %v698_v30, 0.0  ;;  %v741_v39 = vmax.f32 %v727_v43, 0.0 }
 0x17c   : > { %v645_v15 = vpop.f32.mrf.mxu0  ;;  %v674_v16 = vpop.f32.mrf.mxu1 }
 0x17d   : > { %v646_v23 = vadd.f32 %v645_v15, %v602_v20  ;;  %v675_v24 = vadd.f32 %v674_v16, %v602_v20 }
 0x17f   : > { %v746_v56 = vmax.f32 %v646_v23, 0.0  ;;  %v747_v57 = vmax.f32 %v675_v24, 0.0 }
 0x180   : > { %v700_v18 = vpop.f32.mrf.mxu2  ;;  %v729_v19 = vpop.f32.mrf.mxu3 }
 0x181   : > { %v701_v61 = vadd.f32 %v700_v18, %v597_v27  ;;  %v730_v62 = vadd.f32 %v729_v19, %v597_v27 }
 0x183   : > { %v744_v0 = vmax.f32 %v701_v61, 0.0  ;;  %v745_v1 = vmax.f32 %v730_v62, 0.0 }
 0x184   : > { %v648_v21 = vpop.f32.mrf.mxu0  ;;  %v677_v22 = vpop.f32.mrf.mxu1 }
 0x185   : > { %v649_v25 = vadd.f32 %v648_v21, %v607_v17  ;;  %v678_v26 = vadd.f32 %v677_v22, %v607_v17 }
 0x187   : > { %v750_v45 = vmax.f32 %v649_v25, 0.0  ;;  %v751_v46 = vmax.f32 %v678_v26, 0.0 }
 0x188   : > { %v703_v49 = vpop.f32.mrf.mxu2  ;;  %v732_v50 = vpop.f32.mrf.mxu3 }
 0x189   : > { %776 = vmatpush.msra.mxu0 %v750_v45  ;;  %796 = vmatpush.msra.mxu1 %v751_v46  ;;  %v704_v34 = vadd.f32 %v703_v49, %v602_v20  ;;  %v733_v47 = vadd.f32 %v732_v50, %v602_v20 }
 0x18b   : > { %777 = vmatpush.msra.mxu0 %v746_v56  ;;  %797 = vmatpush.msra.mxu1 %v747_v57  ;;  %v748_v44 = vmax.f32 %v704_v34, 0.0  ;;  %v749_v58 = vmax.f32 %v733_v47, 0.0 }
 0x18d   : > { %778 = vmatpush.msra.mxu0 %v742_v59  ;;  %798 = vmatpush.msra.mxu1 %v743_v60 }
 0x18f   : > { %779 = vmatpush.msra.mxu0 %v738_v37  ;;  %799 = vmatpush.msra.mxu1 %v739_v38 }
 0x190   : > { %v706_v53 = vpop.f32.mrf.mxu2  ;;  %v735_v33 = vpop.f32.mrf.mxu3  ;;  %997 = vmatmul.msk.f32.vlgmr.msra.gmra.mxu0 %vm760_vm3, %v306_v52  ;;  %998 = vmatmul.msk.f32.vlgmr.msra.gmra.mxu1 %vm760_vm3, %v306_v52 }
 0x191   : > { %v707_v48 = vadd.f32 %v706_v53, %v607_v17  ;;  %v736_v54 = vadd.f32 %v735_v33, %v607_v17 }
 0x193   : > { %v752_v29 = vmax.f32 %v707_v48, 0.0  ;;  %v753_v63 = vmax.f32 %v736_v54, 0.0 }
 0x195   : > { %816 = vmatpush.msra.mxu2 %v752_v29  ;;  %836 = vmatpush.msra.mxu3 %v753_v63 }
 0x197   : > { %817 = vmatpush.msra.mxu2 %v748_v44  ;;  %837 = vmatpush.msra.mxu3 %v749_v58 }
 0x199   : > { %818 = vmatpush.msra.mxu2 %v744_v0  ;;  %838 = vmatpush.msra.mxu3 %v745_v1 }
 0x19b   : > { %819 = vmatpush.msra.mxu2 %v740_v2  ;;  %839 = vmatpush.msra.mxu3 %v741_v39 }
 0x19c   : > { %999 = vmatmul.msk.f32.vlgmr.msra.gmra.mxu2 %vm760_vm3, %v306_v52  ;;  %1000 = vmatmul.msk.f32.vlgmr.msra.gmra.mxu3 %vm760_vm3, %v306_v52 }
 0x20d   : > { %v801_v35 = vpop.f32.mrf.mxu1  ;;  %v781_v36 = vpop.f32.mrf.mxu0 }
 0x20e   : > { %v802_v4 = vadd.f32 %v801_v35, %v759_v3  ;;  %v782_v9 = vadd.f32 %v781_v36, %v759_v3 }
 0x210   : > { %v848_v31 = vrot.slane %v802_v4, 7 }
 0x212   : > { %v852_v12 = vsel %vm851_vm4, %v782_v9, %v848_v31 }
 0x21f   : > { %v821_v5 = vpop.f32.mrf.mxu2  ;;  %v841_v6 = vpop.f32.mrf.mxu3 }
 0x220   : > { %v822_v32 = vadd.f32 %v821_v5, %v759_v3  ;;  %v842_v8 = vadd.f32 %v841_v6, %v759_v3 }
 0x222   : > { %v849_v10 = vrot.slane %v822_v32, 6  ;;  %v850_v11 = vrot.slane %v842_v8, 5 }
 0x224   : > { %v854_v13 = vsel %vm853_vm5, %v849_v10, %v850_v11 }
 0x225   : > { %v856_v14 = vsel %vm855_vm6, %v852_v12, %v854_v13 }
 0x226   : > { %862 = vst.msk [vmem:[%s274_s15] sm:$0xf] %vm860_vm7, %v856_v14 }
 0x227   : > { %1075 = shalt.err (!%p1072_p3)
}
 0x228   : > { %1005 = dma.vmem_to_hbm [thread:$0]  (%p1191_p5), %s877_s16, 64, %s879_s17, %s864_s14  }
 0x229 PF: > { %p1011_p4 = scmp.ge.s32.totalorder %s1110_s29, 2  ;;  %s890_s25 = sand.u32 1, %s1098_s26  }
 0x22a   : > { %s891_s6 = scalar_lea.sflag [#allocation4], %s890_s25 }
 0x22b   : > { %p1008_p7 = pnand %p1011_p4, %p1195_p6 }
 0x22d   : > { %p1009_p8 = pneg %p1008_p7 }
 0x22f   : > { %1093 = dma.done.wait (%p1009_p8), %s891_s6, 64  }
 0x230   : > { %1095 = vsyncadd (%p1009_p8), %s891_s6, 4294967232  ;;  %p19_p9 = scmp.ge.s32.totalorder %s1179_s8, 4   ;;  %s1419_s26 = smov %s1102_s27 }
 0x231   : > { %s1420_s27 = smov %s1106_s28  ;;  %s1421_s28 = smov %s1189_s11 }
 0x232   : > { %s1422_s29 = smov %s1179_s8  ;;  %21 = sbr.rel (!%p19_p9) target bundleno = 6 (0x6), region = 84 }
 0x237   :  { %897 = vsyncpa [#allocation4], 1 }
 0x238   :  { %899 = vsyncpa [#allocation4 + $0x1], 1 }

</bundles_post_ra>
